<compile_context>
chip_gen: v7x
topology: tpu7x:2x2x1
jax: 0.10.0
libtpu: 0.0.40
codegen_flags: <defaults>
</compile_context>

<pallas_src>
import functools

import jax
import jax.numpy as jnp
from jax.experimental import pallas as pl
from jax.experimental.pallas import tpu as pltpu


def _gap_kernel(x_ref, params_ref, p_ref, o_ref, acc_ref, *, c):
    # Grid = (N//Bt, HW//T).
    #   x_ref: (Bt, C, T)   params_ref: (C+1, O)   p_ref: (1, HW)
    #   o_ref: (Bt, O, HW)  acc_ref: (Bt, C) f32 scratch
    k = pl.program_id(1)

    @pl.when(k == 0)
    def _init():
        acc_ref[...] = jnp.zeros_like(acc_ref)

    # Partial spatial sum of this tile (cross-lane reduce on the XLU; free under DMA).
    x = x_ref[...]                                                     # (Bt, C, T)
    acc_ref[...] += jnp.sum(x.astype(jnp.float32), axis=-1)            # (Bt, C)

    @pl.when(k == pl.num_programs(1) - 1)
    def _finalize():
        s = acc_ref[...]                                               # (Bt, C)
        params = params_ref[...]                                       # (C+1, O)
        a_t = params[:c, :]                                            # (C, O) = A_sum^T
        b = params[c:c + 1, :]                                         # (1, O)
        # A_sum already folds 1/HW, depthwise scale, pointwise weight and BN scale.
        center = jnp.dot(s, a_t, preferred_element_type=jnp.float32) + b   # (Bt, O)
        center = jnp.maximum(center, 0.0)
        edge = jnp.maximum(b, 0.0)                                     # (1, O) = relu(b)
        # Rank-1 bilinear upsample: one broadcasted FMA writes the whole lane-dense slab.
        p = p_ref[...]                                                 # (1, HW)
        out = edge[:, :, None] + (center - edge)[:, :, None] * p[None, :, :]
        o_ref[...] = out.astype(o_ref.dtype)                           # (Bt, O, HW)


def _interp_matrix(dst, src=3):
    """(dst, src) bilinear interpolation weights, align_corners=True."""
    if dst == 1:
        return jnp.zeros((1, src), jnp.float32).at[0, 0].set(1.0)
    s = jnp.arange(dst, dtype=jnp.float32) * ((src - 1) / (dst - 1))
    i0 = jnp.clip(jnp.floor(s), 0, src - 2).astype(jnp.int32)
    frac = s - i0.astype(jnp.float32)
    w = jnp.zeros((dst, src), jnp.float32)
    rows = jnp.arange(dst)
    w = w.at[rows, i0].set(1.0 - frac)
    w = w.at[rows, i0 + 1].add(frac)
    return w


def _divisors(n):
    ds = set()
    i = 1
    while i * i <= n:
        if n % i == 0:
            ds.add(i)
            ds.add(n // i)
        i += 1
    return sorted(ds)


def _sub(v):
    return -(-max(v, 1) // 8) * 8


def _lane(v):
    return -(-max(v, 1) // 128) * 128


def _vmem_capacity_bytes():
    try:
        return int(pltpu.get_tpu_info().vmem_capacity_bytes)
    except Exception:
        return 64 << 20  # conservative fallback (v7x per-TC physical VMEM)


def _pick_hw_tile(hw, row_bytes, budget_bytes):
    """Largest legal lane tile T: divisor of HW, multiple of 128 (or HW itself)."""
    cap_elems = max(128, budget_bytes // max(row_bytes, 1))
    if hw <= cap_elems:
        return hw
    divs = _divisors(hw)
    aligned = [d for d in divs if d % 128 == 0]
    fitting = [d for d in aligned if d <= cap_elems]
    if fitting:
        return max(fitting)
    if aligned:
        return min(aligned)     # smallest legal aligned tile; vmem_limit adapts
    return hw                   # awkward HW with no 128-aligned divisor: whole row


def _pick_batch_tile(n, t, hw, per_image_bytes, budget_bytes):
    """Block several images per grid step when a whole image fits the stream budget."""
    if t != hw:
        return 1
    best = 1
    for d in _divisors(n):
        if d <= 8 and d * per_image_bytes <= budget_bytes:
            best = max(best, d)
    return best


def _vmem_limit_bytes(bt, c, t, o, hw, x_it, out_it, vmem_cap):
    need = (2 * bt * _sub(c) * _lane(t) * x_it          # double-buffered x tiles
            + 2 * bt * _sub(o) * _lane(hw) * out_it     # output slab (double-buffered)
            + 2 * _sub(c + 1) * _lane(o) * 4            # packed params (A^T | b)
            + 2 * 8 * _lane(hw) * 4                     # P row
            + _sub(bt) * _lane(c) * 4)                  # (Bt, C) f32 accumulator
    limit = max(32 << 20, 2 * need, need + (4 << 20))   # headroom over the estimate
    return int(min(limit, vmem_cap - (8 << 20)))        # stay below physical VMEM


def global_avg_pooling_forward(x_nchw, dw_w, dw_b, pw_w, pw_b, bn_scale, bn_bias):
    N, C, H, W = x_nchw.shape
    O = pw_w.shape[0]
    HW = H * W
    f32 = jnp.float32

    dw_w = dw_w.astype(f32).reshape(C)
    dw_b = dw_b.astype(f32).reshape(C)
    pw_w = pw_w.astype(f32).reshape(O, C)
    pw_b = pw_b.astype(f32).reshape(O)
    bn_scale = bn_scale.astype(f32).reshape(O)
    bn_bias = bn_bias.astype(f32).reshape(O)

    # Fold depthwise-1x1 + pointwise-1x1 + BN (+ 1/HW of the mean) into one affine:
    #   center_pre = A_sum @ sum_hw(x) + b,   A_sum = bn_s*(pw_w*dw_w)/HW
    #   edge = relu(b)  (padded pixels see zero input; computed in-kernel from b)
    a_sum = (pw_w * dw_w[None, :]) * bn_scale[:, None] / float(HW)      # (O, C)
    b_eff = bn_scale * (pw_w @ dw_b + pw_b) + bn_bias                   # (O,)

    # Pack A^T and b into a single grid-constant parameter slab: rows 0..C-1 = A^T, row C = b.
    params = jnp.concatenate([a_sum.T, b_eff.reshape(1, O)], axis=0)    # (C+1, O)

    # Rank-1 upsample pattern P[h,w] = Wy[h,1]*Wx[w,1], as a lane-dense (1, HW) row.
    wy1 = _interp_matrix(H)[:, 1]
    wx1 = _interp_matrix(W)[:, 1]
    p_row = (wy1[:, None] * wx1[None, :]).reshape(1, HW)

    # Native layout: NCHW -> (N, C, HW) is a free contiguous reshape (no HBM transpose).
    x_k = x_nchw.reshape(N, C, HW)
    x_it = jnp.dtype(x_k.dtype).itemsize
    out_it = jnp.dtype(x_nchw.dtype).itemsize

    # Generation-aware tiling: per-buffer stream budget from physical VMEM capacity.
    vmem_cap = _vmem_capacity_bytes()
    budget = min(8 << 20, vmem_cap // 12)

    T = _pick_hw_tile(HW, _sub(C) * x_it, budget)
    per_image = _sub(C) * _lane(HW) * x_it + _sub(O) * _lane(HW) * out_it
    Bt = _pick_batch_tile(N, T, HW, per_image, budget)

    grid = (N // Bt, HW // T)
    vmem_limit = _vmem_limit_bytes(Bt, C, T, O, HW, x_it, out_it, vmem_cap)

    out_flat = pl.pallas_call(
        functools.partial(_gap_kernel, c=C),
        out_shape=jax.ShapeDtypeStruct((N, O, HW), x_nchw.dtype),
        grid_spec=pltpu.PrefetchScalarGridSpec(
            num_scalar_prefetch=0,
            grid=grid,
            in_specs=[
                pl.BlockSpec((Bt, C, T), lambda n, k: (n, 0, k)),    # x stream (native layout)
                pl.BlockSpec((C + 1, O), lambda n, k: (0, 0)),       # packed A^T | b
                pl.BlockSpec((1, HW), lambda n, k: (0, 0)),          # P row
            ],
            out_specs=pl.BlockSpec((Bt, O, HW), lambda n, k: (n, 0, 0)),
            scratch_shapes=[pltpu.VMEM((Bt, C), jnp.float32)],
        ),
        compiler_params=pltpu.CompilerParams(
            dimension_semantics=("parallel", "arbitrary"),
            vmem_limit_bytes=vmem_limit,
        ),
    )(x_k, params, p_row)

    return out_flat.reshape(N, O, H, W)


def reference_forward(x_nchw, dw_w, dw_b, pw_w, pw_b, bn_scale, bn_bias):
    """Pure-JAX reference mirroring the PyTorch forward exactly."""
    N, C, H, W = x_nchw.shape
    O = pw_w.shape[0]
    pooled = jnp.mean(x_nchw, axis=(2, 3), keepdims=True)               # (N,C,1,1)
    padded = jnp.pad(pooled, ((0, 0), (0, 0), (1, 1), (1, 1)))           # (N,C,3,3)
    dw = padded * dw_w.reshape(1, C, 1, 1) + dw_b.reshape(1, C, 1, 1)    # depthwise 1x1
    pw = jnp.einsum("oc,nchw->nohw", pw_w, dw) + pw_b.reshape(1, O, 1, 1)
    act = jnp.maximum(pw * bn_scale.reshape(1, O, 1, 1) + bn_bias.reshape(1, O, 1, 1), 0.0)
    Wy = _interp_matrix(H)
    Wx = _interp_matrix(W)
    return jnp.einsum("hi,noij,wj->nohw", Wy, act, Wx)


if __name__ == "__main__":
    N, C, O, H, W = 2, 4, 8, 16, 16

    key = jax.random.PRNGKey(0)
    ks = jax.random.split(key, 5)
    x = jax.random.normal(ks[0], (N, C, H, W), jnp.float32)

    # Deterministic synthetic parameters (kaiming-normal-style scales, random biases).
    dw_w = jax.random.normal(ks[1], (C,), jnp.float32) * (2.0 ** 0.5)
    dw_b = jax.random.normal(ks[2], (C,), jnp.float32) * 0.1
    pw_w = jax.random.normal(ks[3], (O, C), jnp.float32) * ((2.0 / O) ** 0.5)
    pw_b = jax.random.normal(ks[4], (O,), jnp.float32) * 0.1

    # BatchNorm2d(O): weight=1, bias=0, running_mean=0, running_var=1 (eval mode, folded).
    eps = 1e-5
    bn_scale = jnp.ones((O,), jnp.float32) / jnp.sqrt(jnp.ones((O,), jnp.float32) + eps)
    bn_bias = jnp.zeros((O,), jnp.float32)

    out = global_avg_pooling_forward(x, dw_w, dw_b, pw_w, pw_b, bn_scale, bn_bias)
    out = jax.block_until_ready(out)

    ref = reference_forward(x, dw_w, dw_b, pw_w, pw_b, bn_scale, bn_bias)
    assert out.shape == (N, O, H, W), out.shape
    max_err = float(jnp.max(jnp.abs(out - ref)))
    assert jnp.allclose(out, ref, rtol=1e-4, atol=1e-4), f"max abs err = {max_err}"

    print("KERNEL_OK")
</pallas_src>

<mosaic_0001>
module attributes {stable_mosaic.version = 11 : i64} {
  func.func @_gap_kernel(%arg0: i32, %arg1: i32, %arg2: memref<2x4x256xf32, #tpu.memory_space<vmem>>, %arg3: memref<5x8xf32, #tpu.memory_space<vmem>>, %arg4: memref<1x256xf32, #tpu.memory_space<vmem>>, %arg5: memref<2x8x256xf32, #tpu.memory_space<vmem>>, %arg6: memref<2x4xf32, #tpu.memory_space<vmem>>) attributes {dimension_semantics = [#tpu.dimension_semantics<parallel>, #tpu.dimension_semantics<arbitrary>], iteration_bounds = array<i64: 1, 1>, scalar_prefetch = 0 : i64, scratch_operands = 1 : i64, tpu.core_type = #tpu.core_type<tc>, window_params = [{transform_indices = @transform_0, window_bounds = array<i64: 2, 4, 256>}, {pipeline_mode = #tpu.pipeline_mode<synchronous>, transform_indices = @transform_1, window_bounds = array<i64: 5, 8>}, {pipeline_mode = #tpu.pipeline_mode<synchronous>, transform_indices = @transform_2, window_bounds = array<i64: 1, 256>}, {transform_indices = @transform_3, window_bounds = array<i64: 2, 8, 256>}]} {
    %c0_i32 = arith.constant 0 : i32
    %0 = arith.cmpi eq, %arg1, %c0_i32 : i32
    %1 = arith.extui %0 : i1 to i32
    %c0_i32_0 = arith.constant 0 : i32
    %2 = arith.cmpi ne, %1, %c0_i32_0 : i32
    scf.if %2 {
      %cst_9 = arith.constant 0.000000e+00 : f32
      %11 = vector.broadcast %cst_9 : f32 to vector<2x4xf32>
      %c0_10 = arith.constant 0 : index
      %c0_11 = arith.constant 0 : index
      %12 = vector.load %arg6[%c0_10, %c0_11] : memref<2x4xf32, #tpu.memory_space<vmem>>, vector<2x4xf32>
      tpu.vector_store %arg6[%c0_10, %c0_11], %11 {strides = array<i32>} : memref<2x4xf32, #tpu.memory_space<vmem>>, vector<2x4xf32>,
    } else {
    }
    %c0 = arith.constant 0 : index
    %c0_1 = arith.constant 0 : index
    %c0_2 = arith.constant 0 : index
    %3 = vector.load %arg2[%c0, %c0_1, %c0_2] : memref<2x4x256xf32, #tpu.memory_space<vmem>>, vector<2x4x256xf32>
    %c0_3 = arith.constant 0 : index
    %c0_4 = arith.constant 0 : index
    %4 = vector.load %arg6[%c0_3, %c0_4] : memref<2x4xf32, #tpu.memory_space<vmem>>, vector<2x4xf32>
    %cst = arith.constant dense<0.000000e+00> : vector<2x4xf32>
    %5 = vector.multi_reduction <add>, %3, %cst [2] : vector<2x4x256xf32> to vector<2x4xf32>
    %6 = arith.addf %4, %5 : vector<2x4xf32>
    %c0_5 = arith.constant 0 : index
    %c0_6 = arith.constant 0 : index
    %7 = vector.load %arg6[%c0_5, %c0_6] : memref<2x4xf32, #tpu.memory_space<vmem>>, vector<2x4xf32>
    tpu.vector_store %arg6[%c0_5, %c0_6], %6 {strides = array<i32>} : memref<2x4xf32, #tpu.memory_space<vmem>>, vector<2x4xf32>,
    %c0_i32_7 = arith.constant 0 : i32
    %8 = arith.cmpi eq, %arg1, %c0_i32_7 : i32
    %9 = arith.extui %8 : i1 to i32
    %c0_i32_8 = arith.constant 0 : i32
    %10 = arith.cmpi ne, %9, %c0_i32_8 : i32
    scf.if %10 {
      %c0_9 = arith.constant 0 : index
      %c0_10 = arith.constant 0 : index
      %11 = vector.load %arg6[%c0_9, %c0_10] : memref<2x4xf32, #tpu.memory_space<vmem>>, vector<2x4xf32>
      %c0_11 = arith.constant 0 : index
      %c0_12 = arith.constant 0 : index
      %12 = vector.load %arg3[%c0_11, %c0_12] : memref<5x8xf32, #tpu.memory_space<vmem>>, vector<5x8xf32>
      %13 = vector.extract_strided_slice %12 {offsets = [0, 0], sizes = [4, 8], strides = [1, 1]} : vector<5x8xf32> to vector<4x8xf32>
      %14 = vector.extract_strided_slice %12 {offsets = [4, 0], sizes = [1, 8], strides = [1, 1]} : vector<5x8xf32> to vector<1x8xf32>
      %cst_13 = arith.constant dense<0.000000e+00> : vector<2x8xf32>
      %15 = tpu.matmul %11, %13, %cst_13 {dimension_numbers = #tpu.dot_dimension_numbers<[1], [0], [0], [1], [0, 0, 1, 1], [], []>} : vector<2x4xf32>, vector<4x8xf32>, vector<2x8xf32> -> vector<2x8xf32>
      %16 = vector.broadcast %14 : vector<1x8xf32> to vector<2x8xf32>
      %17 = arith.addf %15, %16 : vector<2x8xf32>
      %cst_14 = arith.constant 0.000000e+00 : f32
      %18 = vector.broadcast %cst_14 : f32 to vector<2x8xf32>
      %19 = arith.maximumf %17, %18 : vector<2x8xf32>
      %cst_15 = arith.constant 0.000000e+00 : f32
      %20 = vector.broadcast %cst_15 : f32 to vector<1x8xf32>
      %21 = arith.maximumf %14, %20 : vector<1x8xf32>
      %c0_16 = arith.constant 0 : index
      %c0_17 = arith.constant 0 : index
      %22 = vector.load %arg4[%c0_16, %c0_17] : memref<1x256xf32, #tpu.memory_space<vmem>>, vector<1x256xf32>
      %23 = vector.shape_cast %21 : vector<1x8xf32> to vector<1x8x1xf32>
      %24 = vector.broadcast %21 : vector<1x8xf32> to vector<2x8xf32>
      %25 = arith.subf %19, %24 : vector<2x8xf32>
      %26 = vector.shape_cast %25 : vector<2x8xf32> to vector<2x8x1xf32>
      %27 = vector.shape_cast %22 : vector<1x256xf32> to vector<1x1x256xf32>
      %28 = vector.broadcast %26 : vector<2x8x1xf32> to vector<2x8x256xf32>
      %29 = vector.broadcast %27 : vector<1x1x256xf32> to vector<2x8x256xf32>
      %30 = arith.mulf %28, %29 : vector<2x8x256xf32>
      %31 = vector.broadcast %23 : vector<1x8x1xf32> to vector<2x8x256xf32>
      %32 = arith.addf %31, %30 : vector<2x8x256xf32>
      %c0_18 = arith.constant 0 : index
      %c0_19 = arith.constant 0 : index
      %c0_20 = arith.constant 0 : index
      %33 = vector.load %arg5[%c0_18, %c0_19, %c0_20] : memref<2x8x256xf32, #tpu.memory_space<vmem>>, vector<2x8x256xf32>
      tpu.vector_store %arg5[%c0_18, %c0_19, %c0_20], %32 {strides = array<i32>} : memref<2x8x256xf32, #tpu.memory_space<vmem>>, vector<2x8x256xf32>,
    } else {
    }
    return
  }
  func.func @transform_0(%arg0: i32, %arg1: i32) -> (i32, i32, i32) {
    %c0_i32 = arith.constant 0 : i32
    %c0_i32_0 = arith.constant 0 : i32
    return %arg0, %c0_i32, %arg1 : i32, i32, i32
  }
  func.func @transform_1(%arg0: i32, %arg1: i32) -> (i32, i32) {
    %c0_i32 = arith.constant 0 : i32
    %c0_i32_0 = arith.constant 0 : i32
    %c0_i32_1 = arith.constant 0 : i32
    return %c0_i32, %c0_i32_0 : i32, i32
  }
  func.func @transform_2(%arg0: i32, %arg1: i32) -> (i32, i32) {
    %c0_i32 = arith.constant 0 : i32
    %c0_i32_0 = arith.constant 0 : i32
    %c0_i32_1 = arith.constant 0 : i32
    return %c0_i32, %c0_i32_0 : i32, i32
  }
  func.func @transform_3(%arg0: i32, %arg1: i32) -> (i32, i32, i32) {
    %c0_i32 = arith.constant 0 : i32
    %c0_i32_0 = arith.constant 0 : i32
    %c0_i32_1 = arith.constant 0 : i32
    return %arg0, %c0_i32, %c0_i32_0 : i32, i32, i32
  }
}

</mosaic_0001>

<bundles_post_ra>
// kernel: tpu_custom_call.1
= control target key start
LH: loop header
LB: loop body
LE: loop exit
PB: predicated region body
PF: predicated region fallthrough
CT: control target
= control target key end

     0   :  { %8 = vsyncpa [#allocation4], 0  ;;  %s404_s0 = inlined_call_operand.hbm [shape: f32[2,4,256], index: 0, kind: input, shape index: {}]   ;;  %s405_s1 = inlined_call_operand.hbm [shape: f32[5,8], index: 1, kind: input, shape index: {}]   ;;  %s406_s2 = inlined_call_operand.vmem [shape: f32[1,256], index: 2, kind: input, shape index: {}]   ;;  %s407_s3 = inlined_call_operand.hbm [shape: f32[2,8,256], index: 3, kind: output, shape index: {}]  }
   0x1   :  { %9 = vsyncpa [#allocation7], 0 }
   0x2   :  { %10 = vsyncpa [#allocation5], 0  ;;  %s329_s12 = smov [#allocation3]   ;;  %s257_s16 = scalar_lea.hbm %s404_s0, 256 }
   0x3   :  { %s16_s13 = sshll.u32 %s329_s12, 4  ;;  %p258_p0 = scmp.ne.s32.totalorder %s404_s0, %s257_s16  ;;  %s17_s13 = int_to_ptr.vmem [resolvable:$true] %s16_s13 }
   0x4   :  { %p261_p1 = scmp.lt.u32.totalorder %s257_s16, %s404_s0 }
   0x6   :  { %p263_p2 = pnand %p261_p1, %p258_p0 }
   0x8   :  { %266 = shalt.err (!%p263_p2)
}
   0x9   :  { %s267_s21 = scalar_lea.vmem %s17_s13, 256  ;;  %p272_p4 = scmp.lt.s32.totalorder %s17_s13, %s17_s13 }
   0xa   :  { %p268_p3 = scmp.ne.s32.totalorder %s17_s13, %s267_s21  ;;  %p273_p5 = scmp.lt.s32.totalorder %s267_s21, %s267_s21 }
   0xc   :  { %p274_p6 = por %p273_p5, %p272_p4 }
   0xe   :  { %p275_p7 = pnand %p274_p6, %p268_p3 }
  0x10   :  { %278 = shalt.err (!%p275_p7)
}
  0x11   :  { %s330_s22 = smov 128   ;;  %s331_s23 = smov 8  }
  0x12   :  { %22 = dma.hbm_to_vmem [thread:$0]  %s404_s0, 256, %s17_s13, [#allocation4], %s330_s22, %s330_s22, %s331_s23  }
  0x13   :  { %s332_s26 = smov [#allocation6]   ;;  %s279_s30 = scalar_lea.hbm %s405_s1, 128 }
  0x14   :  { %s29_s27 = sshll.u32 %s332_s26, 4  ;;  %p280_p8 = scmp.ne.s32.totalorder %s405_s1, %s279_s30  ;;  %s30_s27 = int_to_ptr.vmem [resolvable:$true] %s29_s27 }
  0x15   :  { %p283_p9 = scmp.lt.u32.totalorder %s279_s30, %s405_s1 }
  0x17   :  { %p285_p10 = pnand %p283_p9, %p280_p8 }
  0x19   :  { %288 = shalt.err (!%p285_p10)
}
  0x1a   :  { %s289_s8 = scalar_lea.vmem %s30_s27, 128  ;;  %p294_p12 = scmp.lt.s32.totalorder %s30_s27, %s30_s27 }
  0x1b   :  { %p290_p11 = scmp.ne.s32.totalorder %s30_s27, %s289_s8  ;;  %p295_p13 = scmp.lt.s32.totalorder %s289_s8, %s289_s8 }
  0x1d   :  { %p296_p0 = por %p295_p13, %p294_p12 }
  0x1f   :  { %p297_p1 = pnand %p296_p0, %p290_p11 }
  0x21   :  { %300 = shalt.err (!%p297_p1)
}
  0x22   :  { %32 = dma.hbm_to_vmem [thread:$0]  %s405_s1, 128, %s30_s27, [#allocation7]  }
  0x23   :  { %323 = dma.done.wait [#allocation4], 256  }
  0x24   :  { %324 = vsyncadd [#allocation4], 4294967040 }
  0x25   :  { %325 = dma.done.wait [#allocation7], 128  }
  0x26   :  { %326 = vsyncadd [#allocation7], 4294967168  ;;  %vm56_vm0 = vcmask 1043456   ;;  %v47_v0 = vld [vmem:[#allocation3] sm:$0xff]  ;;  %v48_v1 = vld [vmem:[#allocation3 + $0x8] sm:$0xff]  ;;  %vm45_vm1 = vcmask 25600   ;;  %v69_v12 = vlaneseq }
  0x27   :  { %v52_v2 = vcombine.high %v47_v0, %v47_v0  ;;  %v57_v3 = vsel %vm56_vm0, %v47_v0, 0.0  ;;  %v53_v4 = vcombine.high %v48_v1, %v48_v1  ;;  %v62_v6 = vsel %vm56_vm0, %v48_v1, 0.0  ;;  %v89_v11 = vld [vmem:[#allocation6] sm:$0x1f]  ;;  %v173_v37 = vld [vmem:[%s406_s2] sm:$0x3] }
  0x28   :  { %v333_v10 = vmov 0.0   ;;  %vm334_vm2 = vmmov 0   ;;  %v70_v13 = vand.u32 127, %v69_v12  ;;  %v72_v14 = vshrl.u32 %v69_v12, 7  ;;  %s335_s11 = smov [#allocation8]  }
  0x29   :  { %v58_v5 = vsel %vm56_vm0, %v52_v2, 0.0  ;;  %v63_v7 = vsel %vm56_vm0, %v53_v4, 0.0  ;;  %46 = vst.msk [vmem:[#allocation2] sm:$0x3] %vm45_vm1, %v333_v10  ;;  %241 = vmatprep.subr.mxu0 %v333_v10  ;;  %243 = vmatprep.mubr.msk.f32.mxu0 %vm334_vm2, %v333_v10  ;;  %vm79_vm3 = vcmask 1041409   ;;  %vm94_vm4 = vcmask 31744  }
  0x2a   :  { %v59_v8 = vadd.f32 %v58_v5, %v57_v3  ;;  %v64_v9 = vadd.f32 %v63_v7, %v62_v6  ;;  %242 = vmatpush3.msk.msra.mxu0 %vm56_vm0, %v89_v11  ;;  %v73_v16 = vsub.s32 %v70_v13, %v72_v14  ;;  %v172_v24 = vmax.f32 %v89_v11, 0.0  ;;  %s224_s12 = sshll.u32 %s335_s11, 4  ;;  %s225_s12 = int_to_ptr.vmem [resolvable:$true] %s224_s12 }
  0x2b   :  { %v92_v25 = vsub.s32 4, %v72_v14  ;;  %v184_v32 = vsub.s32 0, %v72_v14  ;;  %v191_v35 = vsub.s32 1, %v72_v14  ;;  %s301_s2 = scalar_lea.vmem %s225_s12, 512  ;;  %p306_p3 = scmp.lt.s32.totalorder %s225_s12, %s225_s12 }
  0x2c   :  { %60 = vadd.xlane.f32.xlu0 %v59_v8  ;;  %p302_p2 = scmp.ne.s32.totalorder %s225_s12, %s301_s2  ;;  %p307_p4 = scmp.lt.s32.totalorder %s301_s2, %s301_s2 }
  0x2d   :  { %v177_v26 = vrot.slane %v172_v24, %v92_v25  ;;  %v93_v27 = vrot.slane %v89_v11, %v92_v25  ;;  %v200_v38 = vrot.slane %v173_v37, %v184_v32  ;;  %v204_v39 = vrot.slane %v173_v37, %v191_v35 }
  0x2e   :  { %p308_p5 = por %p307_p4, %p306_p3 }
  0x30   :  { %65 = vadd.xlane.f32.xlu0 %v64_v9  ;;  %v49_v20 = vld [vmem:[#allocation2] sm:$0x3]  ;;  %p309_p6 = pnand %p308_p5, %p302_p2 }
  0x46   :  { %179 = vbcast.lane.b32.xlu0 %v177_v26, 256 }
  0xb9   :  { %v61_v15 = vpop.xlane.xlu0 %60 }
  0xba   :  { %v74_v18 = vrot.slane %v61_v15, %v73_v16 }
  0xbd   :  { %v66_v17 = vpop.xlane.xlu0 %65 }
  0xbe   :  { %v78_v19 = vrot.slane %v66_v17, %v73_v16 }
  0xc0   :  { %v80_v21 = vsel %vm79_vm3, %v78_v19, %v74_v18 }
  0xc1   :  { %v82_v22 = vadd.f32 %v80_v21, %v49_v20  ;;  %v180_v41 = vpop.permute.xlu0 %179 }
  0xc3   :  { %84 = vst.msk [vmem:[#allocation2] sm:$0x3] %vm45_vm1, %v82_v22 }
  0xca   :  { %v88_v23 = vld [vmem:[#allocation2] sm:$0x3] }
  0xcb   :  { %244 = vmatmul.mubr.msk.f32.vlgmr.msra.gmra.mrb[0].mxu0 %vm94_vm4, %v88_v23 }
 0x19e   :  { %v167_v28 = vpop.f32.mrb[0].mxu0 }
 0x19f   :  { %v168_v29 = vadd.f32 %v167_v28, %v93_v27  ;;  %v245_v30 = vpop.f32.mrb[1].mxu0 }
 0x1a1   :  { %v171_v31 = vmax.f32 %v168_v29, 0.0 }
 0x1a3   :  { %v181_v33 = vsub.f32 %v171_v31, %v177_v26 }
 0x1a5   :  { %v185_v34 = vrot.slane %v181_v33, %v184_v32  ;;  %v192_v36 = vrot.slane %v181_v33, %v191_v35 }
 0x1a7   :  { %187 = vbcast.lane.b32.xlu1 %v185_v34, 256 }
 0x1ab   :  { %194 = vbcast.lane.b32.xlu1 %v192_v36, 256 }
 0x219   :  { %v188_v40 = vpop.permute.xlu1 %187 }
 0x21a   :  { %v207_v42 = vmul.f32 %v200_v38, %v188_v40  ;;  %v208_v43 = vmul.f32 %v204_v39, %v188_v40 }
 0x21c   :  { %v211_v44 = vadd.f32 %v207_v42, %v180_v41  ;;  %v212_v45 = vadd.f32 %v208_v43, %v180_v41 }
 0x21d   :  { %v195_v46 = vpop.permute.xlu1 %194 }
 0x21e   :  { %215 = vst [vmem:[#allocation8] sm:$0xff] %v211_v44  ;;  %216 = vst [vmem:[#allocation8 + $0x8] sm:$0xff] %v212_v45  ;;  %v209_v47 = vmul.f32 %v200_v38, %v195_v46  ;;  %v210_v48 = vmul.f32 %v204_v39, %v195_v46 }
 0x220   :  { %v213_v49 = vadd.f32 %v209_v47, %v180_v41  ;;  %v214_v50 = vadd.f32 %v210_v48, %v180_v41 }
 0x222   :  { %217 = vst [vmem:[#allocation8 + $0x10] sm:$0xff] %v213_v49  ;;  %218 = vst [vmem:[#allocation8 + $0x18] sm:$0xff] %v214_v50 }
 0x223   :  { %312 = shalt.err (!%p309_p6)
}
 0x224   :  { %s313_s15 = scalar_lea.hbm %s407_s3, 512 }
 0x225   :  { %p314_p7 = scmp.ne.s32.totalorder %s407_s3, %s313_s15  ;;  %p317_p8 = scmp.lt.u32.totalorder %s313_s15, %s407_s3 }
 0x227   :  { %p319_p9 = pnand %p317_p8, %p314_p7 }
 0x229   :  { %322 = shalt.err (!%p319_p9)
}
 0x22a   :  { %s336_s20 = smov 256   ;;  %s337_s21 = smov 16  }
 0x22b   :  { %230 = dma.vmem_to_hbm [thread:$0]  %s225_s12, 512, %s407_s3, [#allocation5], %s336_s20, %s336_s20, %s337_s21  }
 0x22c   :  { %327 = dma.done.wait [#allocation5], 512  }
 0x22d   :  { %328 = vsyncadd [#allocation5], 4294966784 }
 0x22e   :  { %234 = vsyncpa [#allocation4], 1 }
 0x22f   :  { %235 = vsyncpa [#allocation7], 1 }
 0x230   :  { %236 = vsyncpa [#allocation5], 1 }

</bundles_post_ra>
